<compile_context>
chip_gen: v6e
topology: v6e:2x2x1
jax: 0.10.0
libtpu: 0.0.40
codegen_flags: <defaults>
</compile_context>

<pallas_src>
import functools

import jax
import jax.numpy as jnp
from jax.experimental import pallas as pl
from jax.experimental.pallas import tpu as pltpu


# ----------------------------- tiling helpers --------------------------------

def _pick_tile(dim, candidates):
    """Largest candidate that evenly divides `dim`; else the full dim."""
    for c in candidates:
        if dim >= c and dim % c == 0:
            return c
    return dim


def _dense_vmem_limit(tm, tn, tk):
    """Footprint-derived VMEM limit: double-buffered x/w/b/out + f32 acc,
    with headroom, clamped well under v7x's 64 MiB physical VMEM."""
    x_b = tm * tk * 2          # bf16 activations
    w_b = tk * tn * 2          # bf16 weights
    b_b = tn * 4               # f32 bias row
    o_b = tm * tn * 4          # output (worst case f32)
    acc_b = tm * tn * 4        # f32 accumulator scratch
    footprint = 2 * (x_b + w_b + b_b + o_b) + acc_b
    return int(min(max(2 * footprint + (8 << 20), 16 << 20), 56 << 20))


# ----------------------------- Pallas kernels --------------------------------

def _dense_kernel(x_ref, w_ref, b_ref, o_ref, acc_ref, *, activation):
    """Tiled y = x @ w + b (+ fused activation).  bf16 MXU inputs, f32 acc."""
    @pl.when(pl.program_id(2) == 0)
    def _():
        acc_ref[...] = jnp.zeros_like(acc_ref)

    acc_ref[...] += jnp.dot(x_ref[...], w_ref[...],
                            preferred_element_type=jnp.float32)

    @pl.when(pl.program_id(2) == pl.num_programs(2) - 1)
    def _():
        y = acc_ref[...] + b_ref[...]          # bias in f32
        if activation == "gelu":
            # TODO(synk): HF BERT uses exact erf-GELU; tanh approximation kept
            # for reliable TPU EUP lowering (f32 elementwise for v5e).
            c = jnp.float32(0.7978845608028654)  # sqrt(2/pi)
            y = 0.5 * y * (1.0 + jnp.tanh(c * (y + 0.044715 * y * y * y)))
        elif activation == "tanh":
            y = jnp.tanh(y)
        o_ref[...] = y.astype(o_ref.dtype)


def _layernorm_kernel(x_ref, *rest, eps, has_residual):
    """LayerNorm over the last dim, optionally fused with a residual add."""
    if has_residual:
        r_ref, g_ref, b_ref, o_ref = rest
        x = x_ref[...].astype(jnp.float32) + r_ref[...].astype(jnp.float32)
    else:
        g_ref, b_ref, o_ref = rest
        x = x_ref[...].astype(jnp.float32)
    mean = jnp.mean(x, axis=-1, keepdims=True)
    var = jnp.mean((x - mean) ** 2, axis=-1, keepdims=True)
    inv = jax.lax.rsqrt(var + eps)
    y = (x - mean) * inv * g_ref[...] + b_ref[...]
    o_ref[...] = y.astype(o_ref.dtype)


def _attention_kernel(q_ref, k_ref, v_ref, m_ref, o_ref, *, scale):
    """One (batch, head) grid step: softmax(q k^T + mask_bias) v.

    q/k/v refs: (1, 1, S, dh) bf16 head-major blocks (no in-kernel head
    slicing -> no lane-shuffle copies, bounded live ranges per step),
    m_ref: (1, 1, S) f32 keep-mask, o_ref: (1, 1, S, dh) bf16 context.
    """
    # Fold the softmax scale into q: an S*dh multiply instead of S*S per head.
    q = (q_ref[0, 0].astype(jnp.float32) * scale).astype(jnp.bfloat16)  # (S, dh)
    k = k_ref[0, 0]                                                      # (S, dh)
    v = v_ref[0, 0]                                                      # (S, dh)
    bias = (1.0 - m_ref[0]) * jnp.float32(-1e9)                          # (1, S)

    # q @ k^T without materializing a transpose.
    s = jax.lax.dot_general(
        q, k, dimension_numbers=(((1,), (1,)), ((), ())),
        preferred_element_type=jnp.float32)                              # (S, S)
    s = s + bias
    s = s - jnp.max(s, axis=-1, keepdims=True)
    p = jnp.exp(s)
    p = p * pl.reciprocal(jnp.sum(p, axis=-1, keepdims=True), approx=True)
    ctx = jnp.dot(p.astype(jnp.bfloat16), v,
                  preferred_element_type=jnp.float32)                    # (S, dh)
    o_ref[0, 0] = ctx.astype(o_ref.dtype)


# -------------------------------- wrappers ------------------------------------

def dense(x, w, b, activation=None, out_dtype=jnp.bfloat16):
    """x: (M, K), w: (K, N), b: (1, N) -> (M, N).  Tiled, pipelined MXU matmul."""
    M, K = x.shape
    N = w.shape[1]
    x = x.astype(jnp.bfloat16)
    w = w.astype(jnp.bfloat16)
    b = b.astype(jnp.float32)

    # 256/512-aligned N/K tiles keep the 256-wide v6e/v7x MXU fully fed
    # (H=768 -> 256, I=3072 -> 512); v5e's 4x128 MXU is happy with either.
    tm = _pick_tile(M, (512, 256, 128, 64, 32, 16, 8))
    tn = _pick_tile(N, (512, 256, 128))
    tk = _pick_tile(K, (512, 256, 128))
    grid = (M // tm, N // tn, K // tk)

    kernel = functools.partial(_dense_kernel, activation=activation)
    return pl.pallas_call(
        kernel,
        out_shape=jax.ShapeDtypeStruct((M, N), out_dtype),
        grid=grid,
        in_specs=[
            pl.BlockSpec((tm, tk), lambda i, j, k: (i, k)),
            pl.BlockSpec((tk, tn), lambda i, j, k: (k, j)),
            pl.BlockSpec((1, tn), lambda i, j, k: (0, j)),
        ],
        out_specs=pl.BlockSpec((tm, tn), lambda i, j, k: (i, j)),
        scratch_shapes=[pltpu.VMEM((tm, tn), jnp.float32)],
        compiler_params=pltpu.CompilerParams(
            dimension_semantics=("parallel", "parallel", "arbitrary"),
            vmem_limit_bytes=_dense_vmem_limit(tm, tn, tk)),
    )(x, w, b)


def layernorm(x, gamma, beta, residual=None, eps=1e-12, out_dtype=jnp.bfloat16):
    """x (and optional residual): (M, H); gamma/beta: (1, H).  f32 math."""
    M, H = x.shape
    # HBM-bound: big row tiles amortize the ~0.35us per-grid-step overhead.
    tm = _pick_tile(M, (2048, 1024, 512, 256, 128, 64, 32, 16, 8))
    has_res = residual is not None
    kernel = functools.partial(_layernorm_kernel, eps=eps, has_residual=has_res)

    row_spec = pl.BlockSpec((tm, H), lambda i: (i, 0))
    vec_spec = pl.BlockSpec((1, H), lambda i: (0, 0))
    in_specs = [row_spec] + ([row_spec] if has_res else []) + [vec_spec, vec_spec]
    args = (x, residual, gamma, beta) if has_res else (x, gamma, beta)

    return pl.pallas_call(
        kernel,
        out_shape=jax.ShapeDtypeStruct((M, H), out_dtype),
        grid=(M // tm,),
        in_specs=in_specs,
        out_specs=row_spec,
        compiler_params=pltpu.CompilerParams(
            dimension_semantics=("parallel",)),
    )(*args)


def attention(q, k, v, mask, scale):
    """q/k/v: (B, nh, S, dh) bf16 head-major; mask: (B, 1, S) f32 keep-mask.

    grid=(B, nh), both parallel: B*nh independent steps shard across v7x's two
    TensorCores and pipeline the per-head DMAs against compute."""
    B, nh, S, dh = q.shape
    kernel = functools.partial(_attention_kernel, scale=scale)
    head_spec = pl.BlockSpec((1, 1, S, dh), lambda b, h: (b, h, 0, 0))
    return pl.pallas_call(
        kernel,
        out_shape=jax.ShapeDtypeStruct((B, nh, S, dh), jnp.bfloat16),
        grid=(B, nh),
        in_specs=[
            head_spec, head_spec, head_spec,
            pl.BlockSpec((1, 1, S), lambda b, h: (b, 0, 0)),
        ],
        out_specs=head_spec,
        compiler_params=pltpu.CompilerParams(
            dimension_semantics=("parallel", "parallel")),
    )(q, k, v, mask)


# ----------------------------- synthetic BERT ---------------------------------

def init_params(key, cfg):
    H, I, V, P = cfg["hidden"], cfg["inter"], cfg["vocab"], cfg["max_pos"]
    keys = iter(jax.random.split(key, 128))

    def w(shape, dtype=jnp.bfloat16, scale=0.02):
        return (scale * jax.random.normal(next(keys), shape,
                                          jnp.float32)).astype(dtype)

    params = {
        "word_emb": w((V, H), jnp.float32),
        "pos_emb": w((P, H), jnp.float32),
        "type_emb": w((2, H), jnp.float32),
        "emb_ln_g": jnp.ones((1, H), jnp.float32),
        "emb_ln_b": jnp.zeros((1, H), jnp.float32),
        "pool_w": w((H, H)),
        "pool_b": jnp.zeros((1, H), jnp.float32),
        "layers": [],
    }
    for _ in range(cfg["layers"]):
        params["layers"].append({
            # Fused QKV projection weight/bias: one MXU call instead of three.
            "qkv_w": w((H, 3 * H)), "qkv_b": jnp.zeros((1, 3 * H), jnp.float32),
            "ao_w": w((H, H)), "ao_b": jnp.zeros((1, H), jnp.float32),
            "attn_ln_g": jnp.ones((1, H), jnp.float32),
            "attn_ln_b": jnp.zeros((1, H), jnp.float32),
            "i_w": w((H, I)), "i_b": jnp.zeros((1, I), jnp.float32),
            "o_w": w((I, H)), "o_b": jnp.zeros((1, H), jnp.float32),
            "out_ln_g": jnp.ones((1, H), jnp.float32),
            "out_ln_b": jnp.zeros((1, H), jnp.float32),
        })
    return params


def encoder_layer(x2, mask3, p, cfg, B, S):
    """x2: (B*S, H) bf16 -> (B*S, H) bf16."""
    H, nh, dh = cfg["hidden"], cfg["heads"], cfg["head_dim"]
    scale = 1.0 / float(dh) ** 0.5

    # Fused Q/K/V projection, then head-major re-layout (JAX glue) so the
    # attention kernel consumes whole (S, dh) blocks without in-kernel slices.
    qkv = dense(x2, p["qkv_w"], p["qkv_b"])                      # (B*S, 3H)
    qkv = qkv.reshape(B, S, 3, nh, dh).transpose(2, 0, 3, 1, 4)  # (3, B, nh, S, dh)
    ctx = attention(qkv[0], qkv[1], qkv[2], mask3, scale)        # (B, nh, S, dh)
    ctx = ctx.transpose(0, 2, 1, 3).reshape(B * S, H)

    attn_out = dense(ctx, p["ao_w"], p["ao_b"])
    h1 = layernorm(attn_out, p["attn_ln_g"], p["attn_ln_b"], residual=x2)

    ffn = dense(h1, p["i_w"], p["i_b"], activation="gelu")
    ffn = dense(ffn, p["o_w"], p["o_b"])
    h2 = layernorm(ffn, p["out_ln_g"], p["out_ln_b"], residual=h1)
    return h2


def indobert_for_sts_forward(params, input_ids, attention_mask, cfg):
    """Mirrors IndoBERTForSTS.forward: returns pooler_output (B, H)."""
    B, S = input_ids.shape
    H = cfg["hidden"]

    # Embeddings (gather is JAX glue; LayerNorm is a Pallas kernel).
    # TODO(synk): token_type_ids hard-coded to 0 (single-segment STS inputs).
    x = (params["word_emb"][input_ids]
         + params["pos_emb"][:S][None, :, :]
         + params["type_emb"][0][None, None, :])
    x2 = layernorm(x.reshape(B * S, H),
                   params["emb_ln_g"], params["emb_ln_b"])     # (B*S, H) bf16

    mask3 = attention_mask.astype(jnp.float32).reshape(B, 1, S)
    for layer_params in params["layers"]:
        x2 = encoder_layer(x2, mask3, layer_params, cfg, B, S)

    # Pooler: tanh(W @ hidden[:, 0] + b)  ==  pooler_output (f32).
    cls = x2.reshape(B, S, H)[:, 0, :]                         # (B, H)
    pooled = dense(cls, params["pool_w"], params["pool_b"],
                   activation="tanh", out_dtype=jnp.float32)
    return pooled


# ---------------------------------- main ---------------------------------------

if __name__ == "__main__":
    # Small but lane-dense config (H multiple of 128, S multiple of 8).
    cfg = dict(vocab=128, hidden=128, heads=2, head_dim=64,
               inter=256, layers=2, max_pos=32)

    key = jax.random.PRNGKey(0)
    k_params, k_ids = jax.random.split(key)
    params = init_params(k_params, cfg)

    B, S = 2, 16
    input_ids = jax.random.randint(k_ids, (B, S), 0, cfg["vocab"], dtype=jnp.int32)
    attention_mask = jnp.ones((B, S), dtype=jnp.int32).at[1, 12:].set(0)

    pooler_output = indobert_for_sts_forward(params, input_ids, attention_mask, cfg)
    pooler_output = jax.block_until_ready(pooler_output)

    assert pooler_output.shape == (B, cfg["hidden"])
    assert pooler_output.dtype == jnp.float32
    assert bool(jnp.all(jnp.isfinite(pooler_output)))
    print("KERNEL_OK")
</pallas_src>

<mosaic_0001>
module attributes {stable_mosaic.version = 11 : i64} {
  func.func @_layernorm_kernel(%arg0: i32, %arg1: memref<32x128xf32, #tpu.memory_space<vmem>>, %arg2: memref<1x128xf32, #tpu.memory_space<vmem>>, %arg3: memref<1x128xf32, #tpu.memory_space<vmem>>, %arg4: memref<32x128xbf16, #tpu.memory_space<vmem>>) attributes {dimension_semantics = [#tpu.dimension_semantics<parallel>], iteration_bounds = array<i64: 1>, scalar_prefetch = 0 : i64, scratch_operands = 0 : i64, tpu.core_type = #tpu.core_type<tc>, window_params = [{transform_indices = @transform_0, window_bounds = array<i64: 32, 128>}, {pipeline_mode = #tpu.pipeline_mode<synchronous>, transform_indices = @transform_1, window_bounds = array<i64: 1, 128>}, {pipeline_mode = #tpu.pipeline_mode<synchronous>, transform_indices = @transform_2, window_bounds = array<i64: 1, 128>}, {transform_indices = @transform_3, window_bounds = array<i64: 32, 128>}]} {
    %c0 = arith.constant 0 : index
    %c0_0 = arith.constant 0 : index
    %0 = vector.load %arg1[%c0, %c0_0] : memref<32x128xf32, #tpu.memory_space<vmem>>, vector<32x128xf32>
    %cst = arith.constant dense<0.000000e+00> : vector<32xf32>
    %1 = vector.multi_reduction <add>, %0, %cst [1] : vector<32x128xf32> to vector<32xf32>
    %2 = vector.shape_cast %1 : vector<32xf32> to vector<32x1xf32>
    %cst_1 = arith.constant 1.280000e+02 : f32
    %3 = vector.broadcast %cst_1 : f32 to vector<32x1xf32>
    %4 = arith.divf %2, %3 : vector<32x1xf32>
    %5 = vector.broadcast %4 : vector<32x1xf32> to vector<32x128xf32>
    %6 = arith.subf %0, %5 : vector<32x128xf32>
    %7 = arith.mulf %6, %6 : vector<32x128xf32>
    %cst_2 = arith.constant dense<0.000000e+00> : vector<32xf32>
    %8 = vector.multi_reduction <add>, %7, %cst_2 [1] : vector<32x128xf32> to vector<32xf32>
    %9 = vector.shape_cast %8 : vector<32xf32> to vector<32x1xf32>
    %cst_3 = arith.constant 1.280000e+02 : f32
    %10 = vector.broadcast %cst_3 : f32 to vector<32x1xf32>
    %11 = arith.divf %9, %10 : vector<32x1xf32>
    %cst_4 = arith.constant 9.99999996E-13 : f32
    %12 = vector.broadcast %cst_4 : f32 to vector<32x1xf32>
    %13 = arith.addf %11, %12 : vector<32x1xf32>
    %14 = math.rsqrt %13 : vector<32x1xf32>
    %15 = vector.broadcast %4 : vector<32x1xf32> to vector<32x128xf32>
    %16 = arith.subf %0, %15 : vector<32x128xf32>
    %17 = vector.broadcast %14 : vector<32x1xf32> to vector<32x128xf32>
    %18 = arith.mulf %16, %17 : vector<32x128xf32>
    %c0_5 = arith.constant 0 : index
    %c0_6 = arith.constant 0 : index
    %19 = vector.load %arg2[%c0_5, %c0_6] : memref<1x128xf32, #tpu.memory_space<vmem>>, vector<1x128xf32>
    %20 = vector.broadcast %19 : vector<1x128xf32> to vector<32x128xf32>
    %21 = arith.mulf %18, %20 : vector<32x128xf32>
    %c0_7 = arith.constant 0 : index
    %c0_8 = arith.constant 0 : index
    %22 = vector.load %arg3[%c0_7, %c0_8] : memref<1x128xf32, #tpu.memory_space<vmem>>, vector<1x128xf32>
    %23 = vector.broadcast %22 : vector<1x128xf32> to vector<32x128xf32>
    %24 = arith.addf %21, %23 : vector<32x128xf32>
    %25 = arith.truncf %24 : vector<32x128xf32> to vector<32x128xbf16>
    %c0_9 = arith.constant 0 : index
    %c0_10 = arith.constant 0 : index
    %26 = vector.load %arg4[%c0_9, %c0_10] : memref<32x128xbf16, #tpu.memory_space<vmem>>, vector<32x128xbf16>
    tpu.vector_store %arg4[%c0_9, %c0_10], %25 {strides = array<i32>} : memref<32x128xbf16, #tpu.memory_space<vmem>>, vector<32x128xbf16>,
    return
  }
  func.func @transform_0(%arg0: i32) -> (i32, i32) {
    %c0_i32 = arith.constant 0 : i32
    %c0_i32_0 = arith.constant 0 : i32
    return %arg0, %c0_i32 : i32, i32
  }
  func.func @transform_1(%arg0: i32) -> (i32, i32) {
    %c0_i32 = arith.constant 0 : i32
    %c0_i32_0 = arith.constant 0 : i32
    %c0_i32_1 = arith.constant 0 : i32
    return %c0_i32, %c0_i32_0 : i32, i32
  }
  func.func @transform_2(%arg0: i32) -> (i32, i32) {
    %c0_i32 = arith.constant 0 : i32
    %c0_i32_0 = arith.constant 0 : i32
    %c0_i32_1 = arith.constant 0 : i32
    return %c0_i32, %c0_i32_0 : i32, i32
  }
  func.func @transform_3(%arg0: i32) -> (i32, i32) {
    %c0_i32 = arith.constant 0 : i32
    %c0_i32_0 = arith.constant 0 : i32
    return %arg0, %c0_i32 : i32, i32
  }
}

</mosaic_0001>

<bundles_post_ra>
// kernel: tpu_custom_call.1
= control target key start
LH: loop header
LB: loop body
LE: loop exit
PB: predicated region body
PF: predicated region fallthrough
CT: control target
= control target key end

     0   :  { %8 = vsyncpa [#allocation3], 0  ;;  %s254_s0 = inlined_call_operand.hbm [shape: f32[32,128], index: 0, kind: input, shape index: {}]   ;;  %s255_s1 = inlined_call_operand.vmem [shape: f32[1,128], index: 1, kind: input, shape index: {}]   ;;  %s256_s2 = inlined_call_operand.vmem [shape: f32[1,128], index: 2, kind: input, shape index: {}]   ;;  %s257_s3 = inlined_call_operand.hbm [shape: bf16[32,128], index: 3, kind: output, shape index: {}]  }
   0x1   :  { %9 = vsyncpa [#allocation4], 0  ;;  %s216_s12 = smov [#allocation2]  }
   0x2   :  { %s15_s13 = sshll.u32 %s216_s12, 4  ;;  %s16_s13 = int_to_ptr.vmem [resolvable:$true] %s15_s13 }
   0x3   :  { %s180_s14 = scalar_lea.vmem %s16_s13, 512  ;;  %p185_p1 = scmp.lt.s32.totalorder %s16_s13, %s16_s13 }
   0x4   :  { %p181_p0 = scmp.ne.s32.totalorder %s16_s13, %s180_s14  ;;  %p186_p2 = scmp.lt.s32.totalorder %s180_s14, %s180_s14 }
   0x6   :  { %p187_p3 = por %p186_p2, %p185_p1 }
   0x8   :  { %p188_p4 = pnand %p187_p3, %p181_p0 }
   0xa   :  { %191 = shalt.err (!%p188_p4)
}
   0xb   :  { %s217_s15 = smov 128   ;;  %s218_s16 = smov 8  }
   0xc   :  { %21 = dma.hbm_to_vmem [thread:$0]  %s254_s0, 512, %s16_s13, [#allocation3], %s217_s15, %s217_s15, %s218_s16  }
   0xd   :  { %212 = dma.done.wait [#allocation3], 512  }
   0xe   :  { %213 = vsyncadd [#allocation3], 4294966784  ;;  %v29_v0 = vld [vmem:[#allocation2] sm:$0xff]  ;;  %v31_v1 = vld [vmem:[#allocation2 + $0x10] sm:$0xff]  ;;  %s219_s22 = smov [#allocation5]  }
   0xf   :  { %33 = vadd.xlane.f32.xlu0 %v29_v0  ;;  %37 = vadd.xlane.f32.xlu1 %v31_v1  ;;  %v30_v2 = vld [vmem:[#allocation2 + $0x8] sm:$0xff]  ;;  %v32_v3 = vld [vmem:[#allocation2 + $0x18] sm:$0xff]  ;;  %v137_v34 = vld [vmem:[%s255_s1] ss:$0 sm:$0xff]  ;;  %s125_s23 = sshll.u32 %s219_s22, 4  ;;  %s126_s23 = int_to_ptr.vmem [resolvable:$true] %s125_s23 }
  0x10   :  { %v138_v40 = vld [vmem:[%s256_s2] ss:$0 sm:$0xff]  ;;  %s192_s1 = scalar_lea.vmem %s126_s23, 256  ;;  %p197_p6 = scmp.lt.s32.totalorder %s126_s23, %s126_s23 }
  0x11   :  { %p193_p5 = scmp.ne.s32.totalorder %s126_s23, %s192_s1  ;;  %p198_p7 = scmp.lt.s32.totalorder %s192_s1, %s192_s1 }
  0x13   :  { %35 = vadd.xlane.f32.xlu0 %v30_v2  ;;  %39 = vadd.xlane.f32.xlu1 %v32_v3  ;;  %p199_p8 = por %p198_p7, %p197_p6 }
  0x15   :  { %p200_p9 = pnand %p199_p8, %p193_p5 }
  0x98   :  { %v34_v4 = vpop.xlane.xlu0 %33  ;;  %v38_v5 = vpop.xlane.xlu1 %37 }
  0x99   :  { %v42_v6 = vmul.f32 0.0078125, %v34_v4  ;;  %v44_v7 = vmul.f32 0.0078125, %v38_v5 }
  0x9b   :  { %v46_v8 = vsub.f32 %v29_v0, %v42_v6  ;;  %v48_v9 = vsub.f32 %v31_v1, %v44_v7 }
  0x9c   :  { %v36_v10 = vpop.xlane.xlu0 %35  ;;  %v40_v11 = vpop.xlane.xlu1 %39 }
  0x9d   :  { %v43_v12 = vmul.f32 0.0078125, %v36_v10  ;;  %v50_v13 = vmul.f32 %v46_v8, %v46_v8  ;;  %v45_v14 = vmul.f32 0.0078125, %v40_v11  ;;  %v52_v17 = vmul.f32 %v48_v9, %v48_v9 }
  0x9f   :  { %v47_v15 = vsub.f32 %v30_v2, %v43_v12  ;;  %54 = vadd.xlane.f32.xlu0 %v50_v13  ;;  %v49_v16 = vsub.f32 %v32_v3, %v45_v14 }
  0xa1   :  { %v51_v18 = vmul.f32 %v47_v15, %v47_v15  ;;  %v53_v19 = vmul.f32 %v49_v16, %v49_v16 }
  0xa3   :  { %58 = vadd.xlane.f32.xlu0 %v52_v17  ;;  %56 = vadd.xlane.f32.xlu1 %v51_v18 }
  0xa7   :  { %60 = vadd.xlane.f32.xlu1 %v53_v19 }
 0x128   :  { %v55_v20 = vpop.xlane.xlu0 %54 }
 0x129   :  { %v62_v21 = vmul.f32 0.0078125, %v55_v20 }
 0x12b   :  { %v66_v22 = vadd.f32 1e-12, %v62_v21 }
 0x12c   :  { %v57_v23 = vpop.xlane.xlu1 %56  ;;  %v59_v24 = vpop.xlane.xlu0 %58 }
 0x12d   :  { %164 = vrsqrt.f32 %v66_v22  ;;  %v63_v25 = vmul.f32 0.0078125, %v57_v23  ;;  %v64_v26 = vmul.f32 0.0078125, %v59_v24 }
 0x12f   :  { %v67_v27 = vadd.f32 1e-12, %v63_v25  ;;  %v68_v28 = vadd.f32 1e-12, %v64_v26 }
 0x130   :  { %v61_v29 = vpop.xlane.xlu1 %60 }
 0x131   :  { %166 = vrsqrt.f32 %v67_v27  ;;  %v65_v30 = vmul.f32 0.0078125, %v61_v29 }
 0x132   :  { %168 = vrsqrt.f32 %v68_v28 }
 0x133   :  { %v69_v31 = vadd.f32 1e-12, %v65_v30 }
 0x135   :  { %170 = vrsqrt.f32 %v69_v31 }
 0x13a   :  { %v165_v32 = vpop.eup %164 }
 0x13b   :  { %v74_v33 = vmul.f32 %v165_v32, %v46_v8 }
 0x13d   :  { %v85_v38 = vmul.f32 %v137_v34, %v74_v33 }
 0x13e   :  { %v167_v35 = vpop.eup %166 }
 0x13f   :  { %v169_v36 = vpop.eup %168  ;;  %v75_v37 = vmul.f32 %v167_v35, %v47_v15  ;;  %v96_v45 = vadd.f32 %v138_v40, %v85_v38 }
 0x140   :  { %v76_v39 = vmul.f32 %v169_v36, %v48_v9 }
 0x141   :  { %v86_v41 = vmul.f32 %v137_v34, %v75_v37 }
 0x142   :  { %v171_v42 = vpop.eup %170  ;;  %v87_v44 = vmul.f32 %v137_v34, %v76_v39 }
 0x143   :  { %v77_v43 = vmul.f32 %v171_v42, %v49_v16  ;;  %v97_v46 = vadd.f32 %v138_v40, %v86_v41 }
 0x144   :  { %v98_v49 = vadd.f32 %v138_v40, %v87_v44 }
 0x145   :  { %v88_v47 = vmul.f32 %v137_v34, %v77_v43  ;;  %v150_v48 = vpack.c.bf16 %v97_v46, %v96_v45 }
 0x147   :  { %v99_v50 = vadd.f32 %v138_v40, %v88_v47  ;;  %151 = vst [vmem:[#allocation5] sm:$0xff] %v150_v48  }
 0x149   :  { %v155_v51 = vpack.c.bf16 %v99_v50, %v98_v49 }
 0x14b   :  { %157 = vst [vmem:[#allocation5 + $0x8] sm:$0xff] %v155_v51  }
 0x14c   :  { %203 = shalt.err (!%p200_p9)
}
 0x14d   :  { %s220_s2 = smov 64   ;;  %s221_s24 = smov 4  }
 0x14e   :  { %131 = dma.vmem_to_hbm [thread:$0]  %s126_s23, 256, %s257_s3, [#allocation4], %s220_s2, %s220_s2, %s221_s24  }
 0x14f   :  { %214 = dma.done.wait [#allocation4], 256  }
 0x150   :  { %215 = vsyncadd [#allocation4], 4294967040 }
 0x151   :  { %135 = vsyncpa [#allocation3], 1 }
 0x152   :  { %136 = vsyncpa [#allocation4], 1 }

</bundles_post_ra>
